<compile_context>
chip_gen: v6e
topology: v6e:2x2x1
jax: 0.10.0
libtpu: 0.0.40
codegen_flags: <defaults>
</compile_context>

<pallas_src>
import math

import jax
import jax.numpy as jnp
from jax.experimental import pallas as pl
from jax.experimental.pallas import tpu as pltpu

_LANE = 128


def _custom_relu_kernel(coef_ref, x_ref, o_ref):
    x = x_ref[...]
    pos = coef_ref[0].astype(x.dtype)       # pos_c   (SMEM scalar)
    neg = (-coef_ref[1]).astype(x.dtype)    # -neg_c  (SMEM scalar)
    # out = pos_c * x where x > 0, -neg_c * x where x <= 0  (x == 0 -> 0 either way)
    o_ref[...] = x * jnp.where(x > 0, pos, neg)


def _ceil_to(a, m):
    return -(-a // m) * m


def _sublane_for(itemsize):
    # native vreg tile: (8,128) f32, (16,128) bf16/f16, (32,128) int8/fp8
    return max(8, 32 // max(1, itemsize))


def _choose_cols(total, max_cols=4096):
    """Largest multiple of 128 that divides `total` (<= max_cols), else None."""
    if total % _LANE != 0:
        return None
    m = total // _LANE
    for d in range(min(max_cols // _LANE, m), 0, -1):
        if m % d == 0:
            return _LANE * d
    return _LANE


def _per_generation_params():
    """(target_block_bytes, vmem_limit_bytes or None) for the local TPU."""
    try:
        kind = jax.devices()[0].device_kind.lower()
    except Exception:
        kind = ""
    if "v7" in kind:
        return 8 << 20, 40 << 20           # 4x8 MiB working set > 32 MiB default
    if "v6" in kind:
        return 4 << 20, None               # 16 MiB working set << 32 MiB default
    if "v5" in kind:
        return 2 << 20, None               # 8 MiB working set < 16 MiB default
    return 2 << 20, None                   # unknown: safe everywhere


def custom_relu(x, positive_coef=1.0, negative_coef=0.0,
                *, target_block_bytes=None):
    """Elementwise custom_relu on an arbitrary-shape tensor via a Pallas TPU kernel."""
    orig_shape = x.shape
    total = math.prod(orig_shape)
    itemsize = jnp.dtype(x.dtype).itemsize
    sublane = _sublane_for(itemsize)

    block_bytes, vmem_limit = _per_generation_params()
    if target_block_bytes is not None:
        block_bytes = target_block_bytes

    # ---- lane-dense 2D layout: cols divides total exactly when possible ----
    cols = _choose_cols(total)
    if cols is None:
        # rare fallback (total not a multiple of 128): minimal (<128 elem) pad
        cols = _LANE
        rows = -(-total // cols)
        pad = rows * cols - total
    else:
        rows = total // cols
        pad = 0

    # ---- row tiling: ~block_bytes per block, dtype-aware sublane alignment ----
    max_rows_per_block = max(1, block_bytes // (cols * itemsize))
    if max_rows_per_block >= rows:
        block_rows = rows                                   # single full-extent block
    else:
        block_rows = max(sublane, (max_rows_per_block // sublane) * sublane)

    # megacore: keep at least 2 (even) grid steps when there is enough data
    if pl.cdiv(rows, block_rows) < 2 and rows >= 2 * sublane:
        block_rows = _ceil_to(pl.cdiv(rows, 2), sublane)

    grid = (pl.cdiv(rows, block_rows),)

    flat = x.reshape(-1)
    if pad:
        flat = jnp.pad(flat, (0, pad))
    x2d = flat.reshape(rows, cols)

    coefs = jnp.asarray([positive_coef, negative_coef], dtype=jnp.float32)

    compiler_kwargs = dict(dimension_semantics=("parallel",))
    if vmem_limit is not None:
        compiler_kwargs["vmem_limit_bytes"] = vmem_limit

    out2d = pl.pallas_call(
        _custom_relu_kernel,
        out_shape=jax.ShapeDtypeStruct((rows, cols), x.dtype),
        grid_spec=pltpu.PrefetchScalarGridSpec(
            num_scalar_prefetch=0,
            grid=grid,
            in_specs=[
                pl.BlockSpec(memory_space=pltpu.MemorySpace.SMEM),   # (2,) coefficients
                pl.BlockSpec((block_rows, cols), lambda i: (i, 0)),  # lane-dense x tile
            ],
            out_specs=pl.BlockSpec((block_rows, cols), lambda i: (i, 0)),
        ),
        compiler_params=pltpu.CompilerParams(**compiler_kwargs),
        cost_estimate=pl.CostEstimate(
            flops=2 * total,
            transcendentals=0,
            bytes_accessed=2 * total * itemsize,
        ),
    )(coefs, x2d)

    if pad:
        return out2d.reshape(-1)[:total].reshape(orig_shape)
    return out2d.reshape(orig_shape)


def _reference_custom_relu(x, pos_c, neg_c):
    positive = (x > 0).astype(x.dtype)
    negative = positive - 1
    coefficients = pos_c * positive + neg_c * negative
    return x * coefficients


if __name__ == "__main__":
    key = jax.random.PRNGKey(0)
    x = jax.random.normal(key, (2, 4, 16, 16), dtype=jnp.float32)  # NCHW

    # non-default coefficients so the x <= 0 branch is exercised
    pos_c, neg_c = 1.0, 0.1

    out = custom_relu(x, positive_coef=pos_c, negative_coef=neg_c)
    out = jax.block_until_ready(out)

    ref = _reference_custom_relu(x, pos_c, neg_c)
    assert out.shape == x.shape and out.dtype == x.dtype
    assert jnp.allclose(out, ref, atol=1e-6, rtol=1e-6), "mismatch vs reference"

    # non-divisible-by-128 shape exercises the fallback pad path
    x2 = jax.random.normal(jax.random.PRNGKey(1), (3, 5, 7, 5), dtype=jnp.float32)
    out2 = jax.block_until_ready(custom_relu(x2, pos_c, neg_c))
    assert jnp.allclose(out2, _reference_custom_relu(x2, pos_c, neg_c),
                        atol=1e-6, rtol=1e-6), "mismatch vs reference (ragged)"

    print("KERNEL_OK")
</pallas_src>

<mosaic_0001>
module attributes {stable_mosaic.version = 11 : i64} {
  func.func @_custom_relu_kernel(%arg0: i32, %arg1: memref<2xf32, #tpu.memory_space<smem>>, %arg2: memref<1x2048xf32, #tpu.memory_space<vmem>>, %arg3: memref<1x2048xf32, #tpu.memory_space<vmem>>) attributes {dimension_semantics = [#tpu.dimension_semantics<parallel>], iteration_bounds = array<i64: 1>, scalar_prefetch = 0 : i64, scratch_operands = 0 : i64, tpu.core_type = #tpu.core_type<tc>, window_params = [{transform_indices = @transform_0, window_bounds = array<i64: 2>}, {transform_indices = @transform_1, window_bounds = array<i64: 1, 2048>}, {transform_indices = @transform_2, window_bounds = array<i64: 1, 2048>}]} {
    %c0 = arith.constant 0 : index
    %c0_0 = arith.constant 0 : index
    %0 = vector.load %arg2[%c0, %c0_0] : memref<1x2048xf32, #tpu.memory_space<vmem>>, vector<1x2048xf32>
    %c0_1 = arith.constant 0 : index
    %1 = memref.load %arg1[%c0_1] : memref<2xf32, #tpu.memory_space<smem>>
    %c1 = arith.constant 1 : index
    %2 = memref.load %arg1[%c1] : memref<2xf32, #tpu.memory_space<smem>>
    %cst = arith.constant 0.000000e+00 : f32
    %3 = arith.subf %cst, %2 : f32
    %cst_2 = arith.constant 0.000000e+00 : f32
    %4 = vector.broadcast %cst_2 : f32 to vector<1x2048xf32>
    %5 = arith.cmpf ogt, %0, %4 : vector<1x2048xf32>
    %6 = vector.broadcast %1 : f32 to vector<1x2048xf32>
    %7 = vector.broadcast %3 : f32 to vector<1x2048xf32>
    %8 = arith.select %5, %6, %7 : vector<1x2048xi1>, vector<1x2048xf32>
    %9 = arith.mulf %0, %8 : vector<1x2048xf32>
    %c0_3 = arith.constant 0 : index
    %c0_4 = arith.constant 0 : index
    %10 = vector.load %arg3[%c0_3, %c0_4] : memref<1x2048xf32, #tpu.memory_space<vmem>>, vector<1x2048xf32>
    tpu.vector_store %arg3[%c0_3, %c0_4], %9 {strides = array<i32>} : memref<1x2048xf32, #tpu.memory_space<vmem>>, vector<1x2048xf32>,
    return
  }
  func.func @transform_0(%arg0: i32) -> i32 {
    %c0_i32 = arith.constant 0 : i32
    %c0_i32_0 = arith.constant 0 : i32
    return %c0_i32 : i32
  }
  func.func @transform_1(%arg0: i32) -> (i32, i32) {
    %c0_i32 = arith.constant 0 : i32
    %c0_i32_0 = arith.constant 0 : i32
    return %arg0, %c0_i32 : i32, i32
  }
  func.func @transform_2(%arg0: i32) -> (i32, i32) {
    %c0_i32 = arith.constant 0 : i32
    %c0_i32_0 = arith.constant 0 : i32
    return %arg0, %c0_i32 : i32, i32
  }
}

</mosaic_0001>

<bundles_post_ra>
// kernel: tpu_custom_call.1
= control target key start
LH: loop header
LB: loop body
LE: loop exit
PB: predicated region body
PF: predicated region fallthrough
CT: control target
= control target key end

     0   :  { %7 = vsyncpa [#allocation5], 0  ;;  %s151_s0 = inlined_call_operand.hbm [shape: f32[2], index: 0, kind: input, shape index: {}]   ;;  %s152_s1 = inlined_call_operand.hbm [shape: f32[1,2048], index: 1, kind: input, shape index: {}]   ;;  %s153_s2 = inlined_call_operand.hbm [shape: f32[1,2048], index: 2, kind: output, shape index: {}]  }
   0x1   :  { %8 = vsyncpa [#allocation3], 0 }
   0x2   :  { %9 = vsyncpa [#allocation4], 0  ;;  %s124_s9 = smov [#allocation2]   ;;  %s125_s12 = smov [#allocation6]  }
   0x3   :  { %17 = dma.hbm_to_smem %s151_s0, 16, %s124_s9, [#allocation5]  }
   0x4   :  { %s24_s13 = sshll.u32 %s125_s12, 4  ;;  %s25_s13 = int_to_ptr.vmem [resolvable:$true] %s24_s13 }
   0x5   :  { %s86_s14 = scalar_lea.vmem %s25_s13, 256  ;;  %p91_p1 = scmp.lt.s32.totalorder %s25_s13, %s25_s13 }
   0x6   :  { %p87_p0 = scmp.ne.s32.totalorder %s25_s13, %s86_s14  ;;  %p92_p2 = scmp.lt.s32.totalorder %s86_s14, %s86_s14 }
   0x8   :  { %p93_p3 = por %p92_p2, %p91_p1 }
   0xa   :  { %p94_p4 = pnand %p93_p3, %p87_p0 }
   0xc   :  { %97 = shalt.err (!%p94_p4)
}
   0xd   :  { %27 = dma.hbm_to_vmem [thread:$0]  %s152_s1, 256, %s25_s13, [#allocation3]  }
   0xe   :  { %118 = dma.done.wait [#allocation5], 16  }
   0xf   :  { %119 = vsyncadd [#allocation5], 4294967280 }
  0x10   :  { %120 = dma.done.wait [#allocation3], 256  }
  0x11   :  { %121 = vsyncadd [#allocation3], 4294967040 }
  0x12   :  { %34 = sfence }
  0x13   :  { %s37_s0 = sld [smem:[#allocation2]]  ;;  %v35_v0 = vld [vmem:[#allocation6] sm:$0xff]  ;;  %v36_v1 = vld [vmem:[#allocation6 + $0x8] sm:$0xff]  ;;  %s126_s19 = smov [#allocation7]  }
  0x14   :  { %s66_s17 = sld [smem:[#allocation2 + $0x1]]  ;;  %vm40_vm0 = vcmp.gt.f32.partialorder %v35_v0, 0.0  ;;  %vm41_vm1 = vcmp.gt.f32.partialorder %v36_v1, 0.0  ;;  %s56_s20 = sshll.u32 %s126_s19, 4  ;;  %s57_s20 = int_to_ptr.vmem [resolvable:$true] %s56_s20 }
  0x15   :  { %s98_s1 = scalar_lea.vmem %s57_s20, 256  ;;  %p103_p6 = scmp.lt.s32.totalorder %s57_s20, %s57_s20 }
  0x16   :  { %p99_p5 = scmp.ne.s32.totalorder %s57_s20, %s98_s1  ;;  %p104_p7 = scmp.lt.s32.totalorder %s98_s1, %s98_s1 }
  0x18   :  { %p105_p8 = por %p104_p7, %p103_p6 }
  0x19   :  { %v42_v2 = vstv %s37_s0 }
  0x1a   :  { %s39_s18 = ssub.f32 0.0, %s66_s17  ;;  %p106_p9 = pnand %p105_p8, %p99_p5 }
  0x1c   :  { %v43_v3 = vstv %s39_s18 }
  0x1d   :  { %v44_v4 = vsel %vm40_vm0, %v42_v2, %v43_v3  ;;  %v45_v5 = vsel %vm41_vm1, %v42_v2, %v43_v3 }
  0x1e   :  { %v46_v6 = vmul.f32 %v44_v4, %v35_v0  ;;  %v47_v7 = vmul.f32 %v45_v5, %v36_v1 }
  0x20   :  { %48 = vst [vmem:[#allocation7] sm:$0xff] %v46_v6  ;;  %49 = vst [vmem:[#allocation7 + $0x8] sm:$0xff] %v47_v7 }
  0x21   :  { %109 = shalt.err (!%p106_p9)
}
  0x22   :  { %59 = dma.vmem_to_hbm [thread:$0]  %s57_s20, 256, %s153_s2, [#allocation4]  }
  0x23   :  { %122 = dma.done.wait [#allocation4], 256  }
  0x24   :  { %123 = vsyncadd [#allocation4], 4294967040 }
  0x25   :  { %63 = vsyncpa [#allocation3], 1 }
  0x26   :  { %64 = vsyncpa [#allocation4], 1 }
  0x27   :  { %65 = vsyncpa [#allocation5], 1 }

</bundles_post_ra>
